<compile_context>
chip_gen: v5e
topology: v5e:2x2
jax: 0.10.0
libtpu: 0.0.40
codegen_flags: <defaults>
</compile_context>

<pallas_src>
import functools
import math

import jax
import jax.numpy as jnp
import numpy as np
from jax.experimental import pallas as pl
from jax.experimental.pallas import tpu as pltpu


def _mha_global_head_kernel(
    x_ref, te_ref, mask_ref,
    wqkv_ref, bqkv_ref, wo_ref, bo_ref,
    w1_ref, b1_ref, w2_ref, b2_ref, w3_ref, b3_ref,
    y_ref, attn_ref,
    *, nhead, scale):
    f32 = jnp.float32
    S, Bt, D = x_ref.shape
    SB = S * Bt
    head_dim = D // nhead

    # (S, Bt, D) -> (S*Bt, D); row index = s*Bt + b.  Lane dim (D) unchanged.
    x = x_ref[...].reshape(SB, D)
    te = te_ref[...].reshape(SB, D)
    mask3 = mask_ref[...]                      # (S, Bt, 1), 1.0 == masked-out key

    # ---- Fused QKV: one MXU dot over the stacked [(x+te); x] rows with the (D, 3D) weight.
    big = jnp.concatenate([x + te, x], axis=0)                                    # (2*SB, D)
    proj = jnp.dot(big, wqkv_ref[...], preferred_element_type=f32) + bqkv_ref[...]  # (2*SB, 3D)
    k = proj[:SB, D:2 * D]          # key   = (x + te) @ Wk + bk     (SB, D)
    v = proj[SB:, 2 * D:]           # value =  x       @ Wv + bv     (SB, D)
    q = proj[SB:SB + Bt, :D]        # query =  x[0]    @ Wq + bq     (Bt, D)

    # ---- Head-assignment matrices, built in-kernel (no HBM constants, no int division).
    d_col = jax.lax.broadcasted_iota(jnp.int32, (D, nhead), 0)
    h_col = jax.lax.broadcasted_iota(jnp.int32, (D, nhead), 1)
    hm = jnp.logical_and(d_col >= h_col * head_dim,
                         d_col < (h_col + 1) * head_dim).astype(f32)              # (D, H)
    h_row = jax.lax.broadcasted_iota(jnp.int32, (nhead, D), 0)
    d_row = jax.lax.broadcasted_iota(jnp.int32, (nhead, D), 1)
    hmt = jnp.logical_and(d_row >= h_row * head_dim,
                          d_row < (h_row + 1) * head_dim).astype(f32)             # (H, D)

    # ---- Per-head scores without lane-splitting reshapes:
    # scores[s, b, h] = sum_{d in head h} q[b, d] * k[s, b, d] * scale.
    qk = (k.reshape(S, Bt, D) * q[None, :, :]).reshape(SB, D)
    scores = jnp.dot(qk, hm, preferred_element_type=f32) * scale                  # (SB, H)
    scores = scores.reshape(S, Bt, nhead) + mask3 * (-1e9)                        # (S, Bt, H)

    # ---- Softmax over the key/sequence axis (axis 0).
    m = jnp.max(scores, axis=0, keepdims=True)                                    # (1, Bt, H)
    p = jnp.exp(scores - m)                                                       # (S, Bt, H)
    denom = jnp.sum(p, axis=0, keepdims=True)                                     # (1, Bt, H)
    attn = p * pl.reciprocal(denom, approx=True)                                  # (S, Bt, H)

    # ---- Context: ctx[b, d] = sum_s attn[s, b, head(d)] * v[s, b, d].
    attn_full = jnp.dot(attn.reshape(SB, nhead), hmt,
                        preferred_element_type=f32)                               # (SB, D)
    ctx = jnp.sum((attn_full * v).reshape(S, Bt, D), axis=0)                      # (Bt, D)
    out = jnp.dot(ctx, wo_ref[...], preferred_element_type=f32) + bo_ref[...]     # (Bt, D)

    # ---- MLP head: Linear -> ReLU -> Linear -> ReLU -> Linear.
    h1 = jnp.maximum(jnp.dot(out, w1_ref[...], preferred_element_type=f32) + b1_ref[...], 0.0)
    h2 = jnp.maximum(jnp.dot(h1, w2_ref[...], preferred_element_type=f32) + b2_ref[...], 0.0)
    y = jnp.dot(h2, w3_ref[...], preferred_element_type=f32) + b3_ref[...]        # (Bt, T*O)

    y_ref[...] = y                                                                # (Bt, T*O)
    attn_ref[...] = jnp.mean(attn, axis=-1)                                       # (S, Bt)


def _pick_batch_tile(B, max_tile=128):
    """Largest batch tile that evenly divides B (whole batch in one step if B <= max_tile)."""
    if B <= max_tile:
        return B
    for t in range(max_tile, 7, -1):
        if t % 8 == 0 and B % t == 0:
            return t
    return B  # no aligned divisor: run the whole batch in a single grid step


def multihead_attention_global_head(inputs, type_embedding, mask, params,
                                    num_timesteps, num_outputs, nhead,
                                    batch_tile=None):
    """inputs/type_embedding: (S, B, D); mask: (B, S) bool, True == masked key."""
    S, B, D = inputs.shape
    TO = num_timesteps * num_outputs
    head_dim = D // nhead
    scale = 1.0 / math.sqrt(head_dim)
    f32 = jnp.float32

    # batch_tile can be set explicitly (e.g. B//2 on v7x to spread a small grid over 2 TCs).
    Bt = batch_tile or _pick_batch_tile(B)
    assert B % Bt == 0, "batch tile must divide the batch"
    num_tiles = B // Bt

    # Activations stay in their native (S, B, D) layout -- no wrapper transpose / extra HBM pass.
    x = inputs.astype(f32)
    te = type_embedding.astype(f32)
    # key_padding_mask as a tiny (S, B, 1) float indicator (1.0 == masked key).
    mask_f = jnp.transpose(mask, (1, 0)).astype(f32)[:, :, None]

    # Fused QKV weight / bias (one (D, 3D) matmul operand instead of three (D, D) ones).
    wqkv_t = jnp.concatenate([params["wq_t"], params["wk_t"], params["wv_t"]], axis=1)
    bqkv = jnp.concatenate([params["bq"], params["bk"], params["bv"]])[None, :]

    weights = [
        wqkv_t, bqkv,
        params["wo_t"], params["bo"][None, :],
        params["w1_t"], params["b1"][None, :],
        params["w2_t"], params["b2"][None, :],
        params["w3_t"], params["b3"][None, :],
    ]

    def const_spec(arr):
        nd = arr.ndim
        return pl.BlockSpec(tuple(arr.shape), lambda b, _nd=nd: (0,) * _nd)

    in_specs = [
        pl.BlockSpec((S, Bt, D), lambda b: (0, b, 0)),   # inputs (S-major, batch sliced in spec)
        pl.BlockSpec((S, Bt, D), lambda b: (0, b, 0)),   # type embedding
        pl.BlockSpec((S, Bt, 1), lambda b: (0, b, 0)),   # mask indicator
    ] + [const_spec(w) for w in weights]

    out_shape = (
        jax.ShapeDtypeStruct((B, TO), f32),   # trajectories: batch on sublanes, T*O on lanes
        jax.ShapeDtypeStruct((S, B), f32),    # head-averaged attention: batch on lanes (dense vst)
    )
    out_specs = (
        pl.BlockSpec((Bt, TO), lambda b: (b, 0)),
        pl.BlockSpec((S, Bt), lambda b: (0, b)),
    )

    kernel = functools.partial(_mha_global_head_kernel, nhead=nhead, scale=scale)
    y2, attn_sb = pl.pallas_call(
        kernel,
        grid=(num_tiles,),
        in_specs=in_specs,
        out_specs=out_specs,
        out_shape=out_shape,
        compiler_params=pltpu.CompilerParams(dimension_semantics=("parallel",)),
    )(x, te, mask_f, *weights)

    outputs = y2.reshape(B, num_timesteps, num_outputs)      # (B, T, O)
    attns = jnp.transpose(attn_sb)[:, None, :]                # (B, 1, S) -- tiny array, cheap
    return outputs, attns


def reference_forward(inputs, type_embedding, mask, params, num_timesteps, num_outputs, nhead):
    """Pure-JAX reference matching PyTorch nn.MultiheadAttention (eval) + MLP semantics."""
    S, B, D = inputs.shape
    h = D // nhead
    scale = 1.0 / math.sqrt(h)
    hp = jax.lax.Precision.HIGHEST

    q = inputs[0] @ params["wq_t"] + params["bq"]                                   # (B, D)
    k = jnp.einsum("sbd,de->sbe", inputs + type_embedding, params["wk_t"], precision=hp) + params["bk"]
    v = jnp.einsum("sbd,de->sbe", inputs, params["wv_t"], precision=hp) + params["bv"]

    qh = q.reshape(B, nhead, h)
    kh = k.reshape(S, B, nhead, h)
    vh = v.reshape(S, B, nhead, h)

    scores = jnp.einsum("bnh,sbnh->bns", qh, kh, precision=hp) * scale              # (B, H, S)
    scores = scores + mask.astype(jnp.float32)[:, None, :] * (-1e9)
    attn = jax.nn.softmax(scores, axis=-1)                                          # (B, H, S)

    ctx = jnp.einsum("bns,sbnh->bnh", attn, vh, precision=hp).reshape(B, D)
    out = ctx @ params["wo_t"] + params["bo"]                                       # (B, D)

    h1 = jax.nn.relu(out @ params["w1_t"] + params["b1"])
    h2 = jax.nn.relu(h1 @ params["w2_t"] + params["b2"])
    y = h2 @ params["w3_t"] + params["b3"]
    return y.reshape(B, num_timesteps, num_outputs), attn.mean(axis=1)[:, None, :]


if __name__ == "__main__":
    d_model, nhead = 32, 8
    num_timesteps, num_outputs = 12, 3
    S, B = 8, 2
    D, hid, TO = d_model, 4 * d_model, num_timesteps * num_outputs

    key = jax.random.PRNGKey(0)
    ks = jax.random.split(key, 8)

    def normal(k, shape, std):
        return jax.random.normal(k, shape, dtype=jnp.float32) * std

    # nn.MultiheadAttention params: in_proj (3D, D), biases zero (as in PyTorch init).
    in_proj_w = normal(ks[0], (3 * D, D), 1.0 / math.sqrt(D))
    in_proj_b = jnp.zeros((3 * D,), jnp.float32)
    out_proj_w = normal(ks[1], (D, D), 1.0 / math.sqrt(D))
    out_proj_b = jnp.zeros((D,), jnp.float32)
    # MLP params: kaiming-normal weights, zero biases (MLP.reset_parameters).
    w1 = normal(ks[2], (hid, D), math.sqrt(2.0 / D))
    w2 = normal(ks[3], (hid, hid), math.sqrt(2.0 / hid))
    w3 = normal(ks[4], (TO, hid), math.sqrt(2.0 / hid))

    params = {
        "wq_t": in_proj_w[0:D].T, "wk_t": in_proj_w[D:2 * D].T, "wv_t": in_proj_w[2 * D:].T,
        "bq": in_proj_b[0:D], "bk": in_proj_b[D:2 * D], "bv": in_proj_b[2 * D:],
        "wo_t": out_proj_w.T, "bo": out_proj_b,
        "w1_t": w1.T, "b1": jnp.zeros((hid,), jnp.float32),
        "w2_t": w2.T, "b2": jnp.zeros((hid,), jnp.float32),
        "w3_t": w3.T, "b3": jnp.zeros((TO,), jnp.float32),
    }

    inputs = jax.random.normal(ks[5], (S, B, D), dtype=jnp.float32)
    type_embedding = jax.random.normal(ks[6], (S, B, D), dtype=jnp.float32)
    # key_padding_mask: True == unavailable / masked out (last two keys masked).
    mask = jnp.zeros((B, S), dtype=bool).at[:, S - 2:].set(True)

    outputs, attns = multihead_attention_global_head(
        inputs, type_embedding, mask, params, num_timesteps, num_outputs, nhead)
    outputs, attns = jax.block_until_ready((outputs, attns))

    ref_out, ref_attn = reference_forward(
        inputs, type_embedding, mask, params, num_timesteps, num_outputs, nhead)

    assert outputs.shape == (B, num_timesteps, num_outputs)
    assert attns.shape == (B, 1, S)
    np.testing.assert_allclose(np.asarray(outputs), np.asarray(ref_out), rtol=1e-2, atol=1e-2)
    np.testing.assert_allclose(np.asarray(attns), np.asarray(ref_attn), rtol=1e-2, atol=1e-2)

    print("KERNEL_OK")
</pallas_src>

<mosaic_0001>
module attributes {stable_mosaic.version = 11 : i64} {
  func.func @_mha_global_head_kernel(%arg0: i32, %arg1: memref<8x2x32xf32, #tpu.memory_space<vmem>>, %arg2: memref<8x2x32xf32, #tpu.memory_space<vmem>>, %arg3: memref<8x2x1xf32, #tpu.memory_space<vmem>>, %arg4: memref<32x96xf32, #tpu.memory_space<vmem>>, %arg5: memref<1x96xf32, #tpu.memory_space<vmem>>, %arg6: memref<32x32xf32, #tpu.memory_space<vmem>>, %arg7: memref<1x32xf32, #tpu.memory_space<vmem>>, %arg8: memref<32x128xf32, #tpu.memory_space<vmem>>, %arg9: memref<1x128xf32, #tpu.memory_space<vmem>>, %arg10: memref<128x128xf32, #tpu.memory_space<vmem>>, %arg11: memref<1x128xf32, #tpu.memory_space<vmem>>, %arg12: memref<128x36xf32, #tpu.memory_space<vmem>>, %arg13: memref<1x36xf32, #tpu.memory_space<vmem>>, %arg14: memref<2x36xf32, #tpu.memory_space<vmem>>, %arg15: memref<8x2xf32, #tpu.memory_space<vmem>>) attributes {dimension_semantics = [#tpu.dimension_semantics<parallel>], iteration_bounds = array<i64: 1>, scalar_prefetch = 0 : i64, scratch_operands = 0 : i64, tpu.core_type = #tpu.core_type<tc>, window_params = [{transform_indices = @transform_0, window_bounds = array<i64: 8, 2, 32>}, {transform_indices = @transform_1, window_bounds = array<i64: 8, 2, 32>}, {transform_indices = @transform_2, window_bounds = array<i64: 8, 2, 1>}, {pipeline_mode = #tpu.pipeline_mode<synchronous>, transform_indices = @transform_3, window_bounds = array<i64: 32, 96>}, {pipeline_mode = #tpu.pipeline_mode<synchronous>, transform_indices = @transform_4, window_bounds = array<i64: 1, 96>}, {pipeline_mode = #tpu.pipeline_mode<synchronous>, transform_indices = @transform_5, window_bounds = array<i64: 32, 32>}, {pipeline_mode = #tpu.pipeline_mode<synchronous>, transform_indices = @transform_6, window_bounds = array<i64: 1, 32>}, {pipeline_mode = #tpu.pipeline_mode<synchronous>, transform_indices = @transform_7, window_bounds = array<i64: 32, 128>}, {pipeline_mode = #tpu.pipeline_mode<synchronous>, transform_indices = @transform_8, window_bounds = array<i64: 1, 128>}, {pipeline_mode = #tpu.pipeline_mode<synchronous>, transform_indices = @transform_9, window_bounds = array<i64: 128, 128>}, {pipeline_mode = #tpu.pipeline_mode<synchronous>, transform_indices = @transform_10, window_bounds = array<i64: 1, 128>}, {pipeline_mode = #tpu.pipeline_mode<synchronous>, transform_indices = @transform_11, window_bounds = array<i64: 128, 36>}, {pipeline_mode = #tpu.pipeline_mode<synchronous>, transform_indices = @transform_12, window_bounds = array<i64: 1, 36>}, {transform_indices = @transform_13, window_bounds = array<i64: 2, 36>}, {transform_indices = @transform_14, window_bounds = array<i64: 8, 2>}]} {
    %c0 = arith.constant 0 : index
    %c0_0 = arith.constant 0 : index
    %c0_1 = arith.constant 0 : index
    %0 = vector.load %arg1[%c0, %c0_0, %c0_1] : memref<8x2x32xf32, #tpu.memory_space<vmem>>, vector<8x2x32xf32>
    %1 = vector.shape_cast %0 : vector<8x2x32xf32> to vector<16x32xf32>
    %c0_2 = arith.constant 0 : index
    %c0_3 = arith.constant 0 : index
    %c0_4 = arith.constant 0 : index
    %2 = vector.load %arg2[%c0_2, %c0_3, %c0_4] : memref<8x2x32xf32, #tpu.memory_space<vmem>>, vector<8x2x32xf32>
    %3 = vector.shape_cast %2 : vector<8x2x32xf32> to vector<16x32xf32>
    %c0_5 = arith.constant 0 : index
    %c0_6 = arith.constant 0 : index
    %c0_7 = arith.constant 0 : index
    %4 = vector.load %arg3[%c0_5, %c0_6, %c0_7] : memref<8x2x1xf32, #tpu.memory_space<vmem>>, vector<8x2x1xf32>
    %5 = arith.addf %1, %3 : vector<16x32xf32>
    %6 = tpu.concatenate %5, %1 in 0 : vector<16x32xf32>, vector<16x32xf32> -> vector<32x32xf32>
    %c0_8 = arith.constant 0 : index
    %c0_9 = arith.constant 0 : index
    %7 = vector.load %arg4[%c0_8, %c0_9] : memref<32x96xf32, #tpu.memory_space<vmem>>, vector<32x96xf32>
    %cst = arith.constant dense<0.000000e+00> : vector<32x96xf32>
    %8 = tpu.matmul %6, %7, %cst {dimension_numbers = #tpu.dot_dimension_numbers<[1], [0], [0], [1], [0, 0, 1, 1], [], []>} : vector<32x32xf32>, vector<32x96xf32>, vector<32x96xf32> -> vector<32x96xf32>
    %c0_10 = arith.constant 0 : index
    %c0_11 = arith.constant 0 : index
    %9 = vector.load %arg5[%c0_10, %c0_11] : memref<1x96xf32, #tpu.memory_space<vmem>>, vector<1x96xf32>
    %10 = vector.broadcast %9 : vector<1x96xf32> to vector<32x96xf32>
    %11 = arith.addf %8, %10 : vector<32x96xf32>
    %12 = vector.extract_strided_slice %11 {offsets = [0, 32], sizes = [16, 32], strides = [1, 1]} : vector<32x96xf32> to vector<16x32xf32>
    %13 = vector.extract_strided_slice %11 {offsets = [16, 64], sizes = [16, 32], strides = [1, 1]} : vector<32x96xf32> to vector<16x32xf32>
    %14 = vector.extract_strided_slice %11 {offsets = [16, 0], sizes = [2, 32], strides = [1, 1]} : vector<32x96xf32> to vector<2x32xf32>
    %15 = tpu.iota {dimensions = array<i32: 0>} : vector<32x8xi32>
    %16 = tpu.iota {dimensions = array<i32: 1>} : vector<32x8xi32>
    %c4_i32 = arith.constant 4 : i32
    %17 = vector.broadcast %c4_i32 : i32 to vector<32x8xi32>
    %18 = arith.muli %16, %17 : vector<32x8xi32>
    %19 = arith.cmpi sge, %15, %18 : vector<32x8xi32>
    %c1_i32 = arith.constant 1 : i32
    %20 = vector.broadcast %c1_i32 : i32 to vector<32x8xi32>
    %21 = arith.addi %16, %20 : vector<32x8xi32>
    %c4_i32_12 = arith.constant 4 : i32
    %22 = vector.broadcast %c4_i32_12 : i32 to vector<32x8xi32>
    %23 = arith.muli %21, %22 : vector<32x8xi32>
    %24 = arith.cmpi slt, %15, %23 : vector<32x8xi32>
    %25 = arith.andi %19, %24 : vector<32x8xi1>
    %26 = arith.extui %25 : vector<32x8xi1> to vector<32x8xi32>
    %27 = arith.sitofp %26 : vector<32x8xi32> to vector<32x8xf32>
    %28 = tpu.iota {dimensions = array<i32: 0>} : vector<8x32xi32>
    %29 = tpu.iota {dimensions = array<i32: 1>} : vector<8x32xi32>
    %c4_i32_13 = arith.constant 4 : i32
    %30 = vector.broadcast %c4_i32_13 : i32 to vector<8x32xi32>
    %31 = arith.muli %28, %30 : vector<8x32xi32>
    %32 = arith.cmpi sge, %29, %31 : vector<8x32xi32>
    %c1_i32_14 = arith.constant 1 : i32
    %33 = vector.broadcast %c1_i32_14 : i32 to vector<8x32xi32>
    %34 = arith.addi %28, %33 : vector<8x32xi32>
    %c4_i32_15 = arith.constant 4 : i32
    %35 = vector.broadcast %c4_i32_15 : i32 to vector<8x32xi32>
    %36 = arith.muli %34, %35 : vector<8x32xi32>
    %37 = arith.cmpi slt, %29, %36 : vector<8x32xi32>
    %38 = arith.andi %32, %37 : vector<8x32xi1>
    %39 = arith.extui %38 : vector<8x32xi1> to vector<8x32xi32>
    %40 = arith.sitofp %39 : vector<8x32xi32> to vector<8x32xf32>
    %41 = vector.shape_cast %12 : vector<16x32xf32> to vector<8x2x32xf32>
    %42 = vector.shape_cast %14 : vector<2x32xf32> to vector<1x2x32xf32>
    %43 = vector.broadcast %42 : vector<1x2x32xf32> to vector<8x2x32xf32>
    %44 = arith.mulf %41, %43 : vector<8x2x32xf32>
    %45 = vector.shape_cast %44 : vector<8x2x32xf32> to vector<16x32xf32>
    %cst_16 = arith.constant dense<0.000000e+00> : vector<16x8xf32>
    %46 = tpu.matmul %45, %27, %cst_16 {dimension_numbers = #tpu.dot_dimension_numbers<[1], [0], [0], [1], [0, 0, 1, 1], [], []>} : vector<16x32xf32>, vector<32x8xf32>, vector<16x8xf32> -> vector<16x8xf32>
    %cst_17 = arith.constant 5.000000e-01 : f32
    %47 = vector.broadcast %cst_17 : f32 to vector<16x8xf32>
    %48 = arith.mulf %46, %47 : vector<16x8xf32>
    %49 = vector.shape_cast %48 : vector<16x8xf32> to vector<8x2x8xf32>
    %cst_18 = arith.constant -1.000000e+09 : f32
    %50 = vector.broadcast %cst_18 : f32 to vector<8x2x1xf32>
    %51 = arith.mulf %4, %50 : vector<8x2x1xf32>
    %52 = vector.broadcast %51 : vector<8x2x1xf32> to vector<8x2x8xf32>
    %53 = arith.addf %49, %52 : vector<8x2x8xf32>
    %cst_19 = arith.constant dense<0xFF800000> : vector<2x8xf32>
    %54 = vector.multi_reduction <maximumf>, %53, %cst_19 [0] : vector<8x2x8xf32> to vector<2x8xf32>
    %55 = vector.shape_cast %54 : vector<2x8xf32> to vector<1x2x8xf32>
    %56 = vector.broadcast %55 : vector<1x2x8xf32> to vector<8x2x8xf32>
    %57 = arith.subf %53, %56 : vector<8x2x8xf32>
    %58 = math.exp %57 : vector<8x2x8xf32>
    %cst_20 = arith.constant dense<0.000000e+00> : vector<2x8xf32>
    %59 = vector.multi_reduction <add>, %58, %cst_20 [0] : vector<8x2x8xf32> to vector<2x8xf32>
    %60 = vector.shape_cast %59 : vector<2x8xf32> to vector<1x2x8xf32>
    %61 = tpu.reciprocal %60 {approx = true} : vector<1x2x8xf32> -> vector<1x2x8xf32>
    %62 = vector.broadcast %61 : vector<1x2x8xf32> to vector<8x2x8xf32>
    %63 = arith.mulf %58, %62 : vector<8x2x8xf32>
    %64 = vector.shape_cast %63 : vector<8x2x8xf32> to vector<16x8xf32>
    %cst_21 = arith.constant dense<0.000000e+00> : vector<16x32xf32>
    %65 = tpu.matmul %64, %40, %cst_21 {dimension_numbers = #tpu.dot_dimension_numbers<[1], [0], [0], [1], [0, 0, 1, 1], [], []>} : vector<16x8xf32>, vector<8x32xf32>, vector<16x32xf32> -> vector<16x32xf32>
    %66 = arith.mulf %65, %13 : vector<16x32xf32>
    %67 = vector.shape_cast %66 : vector<16x32xf32> to vector<8x2x32xf32>
    %cst_22 = arith.constant dense<0.000000e+00> : vector<2x32xf32>
    %68 = vector.multi_reduction <add>, %67, %cst_22 [0] : vector<8x2x32xf32> to vector<2x32xf32>
    %c0_23 = arith.constant 0 : index
    %c0_24 = arith.constant 0 : index
    %69 = vector.load %arg6[%c0_23, %c0_24] : memref<32x32xf32, #tpu.memory_space<vmem>>, vector<32x32xf32>
    %cst_25 = arith.constant dense<0.000000e+00> : vector<2x32xf32>
    %70 = tpu.matmul %68, %69, %cst_25 {dimension_numbers = #tpu.dot_dimension_numbers<[1], [0], [0], [1], [0, 0, 1, 1], [], []>} : vector<2x32xf32>, vector<32x32xf32>, vector<2x32xf32> -> vector<2x32xf32>
    %c0_26 = arith.constant 0 : index
    %c0_27 = arith.constant 0 : index
    %71 = vector.load %arg7[%c0_26, %c0_27] : memref<1x32xf32, #tpu.memory_space<vmem>>, vector<1x32xf32>
    %72 = vector.broadcast %71 : vector<1x32xf32> to vector<2x32xf32>
    %73 = arith.addf %70, %72 : vector<2x32xf32>
    %c0_28 = arith.constant 0 : index
    %c0_29 = arith.constant 0 : index
    %74 = vector.load %arg8[%c0_28, %c0_29] : memref<32x128xf32, #tpu.memory_space<vmem>>, vector<32x128xf32>
    %cst_30 = arith.constant dense<0.000000e+00> : vector<2x128xf32>
    %75 = tpu.matmul %73, %74, %cst_30 {dimension_numbers = #tpu.dot_dimension_numbers<[1], [0], [0], [1], [0, 0, 1, 1], [], []>} : vector<2x32xf32>, vector<32x128xf32>, vector<2x128xf32> -> vector<2x128xf32>
    %c0_31 = arith.constant 0 : index
    %c0_32 = arith.constant 0 : index
    %76 = vector.load %arg9[%c0_31, %c0_32] : memref<1x128xf32, #tpu.memory_space<vmem>>, vector<1x128xf32>
    %77 = vector.broadcast %76 : vector<1x128xf32> to vector<2x128xf32>
    %78 = arith.addf %75, %77 : vector<2x128xf32>
    %cst_33 = arith.constant 0.000000e+00 : f32
    %79 = vector.broadcast %cst_33 : f32 to vector<2x128xf32>
    %80 = arith.maximumf %78, %79 : vector<2x128xf32>
    %c0_34 = arith.constant 0 : index
    %c0_35 = arith.constant 0 : index
    %81 = vector.load %arg10[%c0_34, %c0_35] : memref<128x128xf32, #tpu.memory_space<vmem>>, vector<128x128xf32>
    %cst_36 = arith.constant dense<0.000000e+00> : vector<2x128xf32>
    %82 = tpu.matmul %80, %81, %cst_36 {dimension_numbers = #tpu.dot_dimension_numbers<[1], [0], [0], [1], [0, 0, 1, 1], [], []>} : vector<2x128xf32>, vector<128x128xf32>, vector<2x128xf32> -> vector<2x128xf32>
    %c0_37 = arith.constant 0 : index
    %c0_38 = arith.constant 0 : index
    %83 = vector.load %arg11[%c0_37, %c0_38] : memref<1x128xf32, #tpu.memory_space<vmem>>, vector<1x128xf32>
    %84 = vector.broadcast %83 : vector<1x128xf32> to vector<2x128xf32>
    %85 = arith.addf %82, %84 : vector<2x128xf32>
    %cst_39 = arith.constant 0.000000e+00 : f32
    %86 = vector.broadcast %cst_39 : f32 to vector<2x128xf32>
    %87 = arith.maximumf %85, %86 : vector<2x128xf32>
    %c0_40 = arith.constant 0 : index
    %c0_41 = arith.constant 0 : index
    %88 = vector.load %arg12[%c0_40, %c0_41] : memref<128x36xf32, #tpu.memory_space<vmem>>, vector<128x36xf32>
    %cst_42 = arith.constant dense<0.000000e+00> : vector<2x36xf32>
    %89 = tpu.matmul %87, %88, %cst_42 {dimension_numbers = #tpu.dot_dimension_numbers<[1], [0], [0], [1], [0, 0, 1, 1], [], []>} : vector<2x128xf32>, vector<128x36xf32>, vector<2x36xf32> -> vector<2x36xf32>
    %c0_43 = arith.constant 0 : index
    %c0_44 = arith.constant 0 : index
    %90 = vector.load %arg13[%c0_43, %c0_44] : memref<1x36xf32, #tpu.memory_space<vmem>>, vector<1x36xf32>
    %91 = vector.broadcast %90 : vector<1x36xf32> to vector<2x36xf32>
    %92 = arith.addf %89, %91 : vector<2x36xf32>
    %c0_45 = arith.constant 0 : index
    %c0_46 = arith.constant 0 : index
    %93 = vector.load %arg14[%c0_45, %c0_46] : memref<2x36xf32, #tpu.memory_space<vmem>>, vector<2x36xf32>
    tpu.vector_store %arg14[%c0_45, %c0_46], %92 {strides = array<i32>} : memref<2x36xf32, #tpu.memory_space<vmem>>, vector<2x36xf32>,
    %cst_47 = arith.constant dense<0.000000e+00> : vector<8x2xf32>
    %94 = vector.multi_reduction <add>, %63, %cst_47 [2] : vector<8x2x8xf32> to vector<8x2xf32>
    %cst_48 = arith.constant 8.000000e+00 : f32
    %95 = vector.broadcast %cst_48 : f32 to vector<8x2xf32>
    %96 = arith.divf %94, %95 : vector<8x2xf32>
    %c0_49 = arith.constant 0 : index
    %c0_50 = arith.constant 0 : index
    %97 = vector.load %arg15[%c0_49, %c0_50] : memref<8x2xf32, #tpu.memory_space<vmem>>, vector<8x2xf32>
    tpu.vector_store %arg15[%c0_49, %c0_50], %96 {strides = array<i32>} : memref<8x2xf32, #tpu.memory_space<vmem>>, vector<8x2xf32>,
    return
  }
  func.func @transform_0(%arg0: i32) -> (i32, i32, i32) {
    %c0_i32 = arith.constant 0 : i32
    %c0_i32_0 = arith.constant 0 : i32
    %c0_i32_1 = arith.constant 0 : i32
    return %c0_i32, %arg0, %c0_i32_0 : i32, i32, i32
  }
  func.func @transform_1(%arg0: i32) -> (i32, i32, i32) {
    %c0_i32 = arith.constant 0 : i32
    %c0_i32_0 = arith.constant 0 : i32
    %c0_i32_1 = arith.constant 0 : i32
    return %c0_i32, %arg0, %c0_i32_0 : i32, i32, i32
  }
  func.func @transform_2(%arg0: i32) -> (i32, i32, i32) {
    %c0_i32 = arith.constant 0 : i32
    %c0_i32_0 = arith.constant 0 : i32
    %c0_i32_1 = arith.constant 0 : i32
    return %c0_i32, %arg0, %c0_i32_0 : i32, i32, i32
  }
  func.func @transform_3(%arg0: i32) -> (i32, i32) {
    %c0_i32 = arith.constant 0 : i32
    %c0_i32_0 = arith.constant 0 : i32
    %c0_i32_1 = arith.constant 0 : i32
    return %c0_i32, %c0_i32_0 : i32, i32
  }
  func.func @transform_4(%arg0: i32) -> (i32, i32) {
    %c0_i32 = arith.constant 0 : i32
    %c0_i32_0 = arith.constant 0 : i32
    %c0_i32_1 = arith.constant 0 : i32
    return %c0_i32, %c0_i32_0 : i32, i32
  }
  func.func @transform_5(%arg0: i32) -> (i32, i32) {
    %c0_i32 = arith.constant 0 : i32
    %c0_i32_0 = arith.constant 0 : i32
    %c0_i32_1 = arith.constant 0 : i32
    return %c0_i32, %c0_i32_0 : i32, i32
  }
  func.func @transform_6(%arg0: i32) -> (i32, i32) {
    %c0_i32 = arith.constant 0 : i32
    %c0_i32_0 = arith.constant 0 : i32
    %c0_i32_1 = arith.constant 0 : i32
    return %c0_i32, %c0_i32_0 : i32, i32
  }
  func.func @transform_7(%arg0: i32) -> (i32, i32) {
    %c0_i32 = arith.constant 0 : i32
    %c0_i32_0 = arith.constant 0 : i32
    %c0_i32_1 = arith.constant 0 : i32
    return %c0_i32, %c0_i32_0 : i32, i32
  }
  func.func @transform_8(%arg0: i32) -> (i32, i32) {
    %c0_i32 = arith.constant 0 : i32
    %c0_i32_0 = arith.constant 0 : i32
    %c0_i32_1 = arith.constant 0 : i32
    return %c0_i32, %c0_i32_0 : i32, i32
  }
  func.func @transform_9(%arg0: i32) -> (i32, i32) {
    %c0_i32 = arith.constant 0 : i32
    %c0_i32_0 = arith.constant 0 : i32
    %c0_i32_1 = arith.constant 0 : i32
    return %c0_i32, %c0_i32_0 : i32, i32
  }
  func.func @transform_10(%arg0: i32) -> (i32, i32) {
    %c0_i32 = arith.constant 0 : i32
    %c0_i32_0 = arith.constant 0 : i32
    %c0_i32_1 = arith.constant 0 : i32
    return %c0_i32, %c0_i32_0 : i32, i32
  }
  func.func @transform_11(%arg0: i32) -> (i32, i32) {
    %c0_i32 = arith.constant 0 : i32
    %c0_i32_0 = arith.constant 0 : i32
    %c0_i32_1 = arith.constant 0 : i32
    return %c0_i32, %c0_i32_0 : i32, i32
  }
  func.func @transform_12(%arg0: i32) -> (i32, i32) {
    %c0_i32 = arith.constant 0 : i32
    %c0_i32_0 = arith.constant 0 : i32
    %c0_i32_1 = arith.constant 0 : i32
    return %c0_i32, %c0_i32_0 : i32, i32
  }
  func.func @transform_13(%arg0: i32) -> (i32, i32) {
    %c0_i32 = arith.constant 0 : i32
    %c0_i32_0 = arith.constant 0 : i32
    return %arg0, %c0_i32 : i32, i32
  }
  func.func @transform_14(%arg0: i32) -> (i32, i32) {
    %c0_i32 = arith.constant 0 : i32
    %c0_i32_0 = arith.constant 0 : i32
    return %c0_i32, %arg0 : i32, i32
  }
}

</mosaic_0001>

<bundles_post_ra>
// kernel: tpu_custom_call.1
= control target key start
LH: loop header
LB: loop body
LE: loop exit
PB: predicated region body
PF: predicated region fallthrough
CT: control target
= control target key end

     0   :  { %20 = vsyncpa [#allocation3], 0  ;;  %s1403_s0 = inlined_call_operand.hbm [shape: f32[8,2,32], index: 0, kind: input, shape index: {}]   ;;  %s1404_s1 = inlined_call_operand.hbm [shape: f32[8,2,32], index: 1, kind: input, shape index: {}]   ;;  %s1405_s2 = inlined_call_operand.vmem [shape: f32[8,2,1], index: 2, kind: input, shape index: {}]   ;;  %s1406_s3 = inlined_call_operand.vmem [shape: f32[32,96], index: 3, kind: input, shape index: {}]   ;;  %s1407_s4 = inlined_call_operand.vmem [shape: f32[1,96], index: 4, kind: input, shape index: {}]   ;;  %s1408_s5 = inlined_call_operand.vmem [shape: f32[32,32], index: 5, kind: input, shape index: {}]   ;;  %s1409_s6 = inlined_call_operand.vmem [shape: f32[1,32], index: 6, kind: input, shape index: {}]   ;;  %s1410_s7 = inlined_call_operand.hbm [shape: f32[32,128], index: 7, kind: input, shape index: {}]   ;;  %s1411_s8 = inlined_call_operand.hbm [shape: f32[1,128], index: 8, kind: input, shape index: {}]   ;;  %s1412_s9 = inlined_call_operand.vmem [shape: f32[128,128], index: 9, kind: input, shape index: {}]   ;;  %s1413_s10 = inlined_call_operand.hbm [shape: f32[1,128], index: 10, kind: input, shape index: {}]   ;;  %s1414_s11 = inlined_call_operand.vmem [shape: f32[128,36], index: 11, kind: input, shape index: {}]   ;;  %s1415_s12 = inlined_call_operand.vmem [shape: f32[1,36], index: 12, kind: input, shape index: {}]   ;;  %s1416_s13 = inlined_call_operand.hbm [shape: f32[2,36], index: 13, kind: output, shape index: {0}]   ;;  %s1417_s14 = inlined_call_operand.vmem [shape: f32[8,2], index: 14, kind: output, shape index: {1}]  }
   0x1   :  { %21 = vsyncpa [#allocation6], 0 }
   0x2   :  { %22 = vsyncpa [#allocation9], 0 }
   0x3   :  { %23 = vsyncpa [#allocation4], 0  ;;  %s41_s15 = sshll.u32 %s1404_s1, 4  ;;  %s1053_s16 = smov [#allocation5]   ;;  %s42_s15 = int_to_ptr.hbm [resolvable:$true] %s41_s15 }
   0x4   :  { %s43_s17 = sshll.u32 %s1053_s16, 4  ;;  %s78_s20 = sshll.u32 %s1411_s8, 4  ;;  %s44_s17 = int_to_ptr.vmem [resolvable:$true] %s43_s17  ;;  %s79_s20 = int_to_ptr.hbm [resolvable:$true] %s78_s20 }
   0x5   :  { %s1054_s21 = smov 32   ;;  %s1055_s22 = smov 2  }
   0x6   :  { %49 = dma.hbm_to_vmem [thread:$0]  %s42_s15, 256, %s44_s17, [#allocation6], %s1054_s21, %s1054_s21, %s1055_s22  }
   0x7   :  { %s1056_s23 = smov [#allocation8]   ;;  %s28_s1 = sshll.u32 %s1403_s0, 4  ;;  %s29_s1 = int_to_ptr.hbm [resolvable:$true] %s28_s1 }
   0x8   :  { %s80_s24 = sshll.u32 %s1056_s23, 4  ;;  %s64_s29 = sshll.u32 %s1410_s7, 4  ;;  %s81_s24 = int_to_ptr.vmem [resolvable:$true] %s80_s24  ;;  %s65_s29 = int_to_ptr.hbm [resolvable:$true] %s64_s29 }
   0x9   :  { %83 = dma.hbm_to_vmem [thread:$0]  %s79_s20, 16, %s81_s24, [#allocation9]  }
   0xa   :  { %s1057_s8 = smov [#allocation2]   ;;  %s1058_s15 = smov [#allocation7]  }
   0xb   :  { %s30_s30 = sshll.u32 %s1057_s8, 4  ;;  %s66_s16 = sshll.u32 %s1058_s15, 4  ;;  %s31_s30 = int_to_ptr.vmem [resolvable:$true] %s30_s30  ;;  %s67_s16 = int_to_ptr.vmem [resolvable:$true] %s66_s16 }
   0xc   :  { %36 = dma.hbm_to_vmem [thread:$0]  %s29_s1, 256, %s31_s30, [#allocation3], %s1054_s21, %s1054_s21, %s1055_s22  }
   0xd   :  { %s1059_s17 = smov 128   ;;  %s1060_s18 = smov 8  }
   0xe   :  { %72 = dma.hbm_to_vmem [thread:$0]  %s65_s29, 512, %s67_s16, [#allocation6], %s1059_s17, %s1059_s17, %s1060_s18  }
   0xf   :  { %s91_s20 = sshll.u32 %s1413_s10, 4  ;;  %s1061_s23 = smov [#allocation10]   ;;  %s92_s20 = int_to_ptr.hbm [resolvable:$true] %s91_s20 }
  0x10   :  { %s93_s7 = sshll.u32 %s1061_s23, 4  ;;  %s94_s7 = int_to_ptr.vmem [resolvable:$true] %s93_s7 }
  0x11   :  { %96 = dma.hbm_to_vmem [thread:$0]  %s92_s20, 16, %s94_s7, [#allocation9]  }
  0x12   :  { %1045 = dma.done.wait [#allocation3], 256  }
  0x13   :  { %1046 = vsyncadd [#allocation3], 4294967040 }
  0x14   :  { %1047 = dma.done.wait [#allocation6], 768  }
  0x15   :  { %1048 = vsyncadd [#allocation6], 4294966528 }
  0x16   :  { %1049 = dma.done.wait [#allocation9], 32  }
  0x17   :  { %1050 = vsyncadd [#allocation9], 4294967264  ;;  %v206_v0 = vld [vmem:[%s1406_s3 + $0x18] sm:$0xff]  ;;  %v205_v1 = vld [vmem:[%s1406_s3 + $0x10] sm:$0xff]  ;;  %vm211_vm0 = vcmask 261120   ;;  %v1062_v37 = vmov 0   ;;  %v249_v40 = vlaneseq }
  0x18   :  { %232 = vmatpush.msra.mxu0 %v206_v0  ;;  %v204_v2 = vld [vmem:[%s1406_s3 + $0x8] sm:$0xff]  ;;  %v203_v5 = vld [vmem:[%s1406_s3] sm:$0xff]  ;;  %v129_v8 = vld [vmem:[#allocation5] sm:$0x3]  ;;  %875 = vset.pattern.permute.xlu0 %v1062_v37  ;;  %s1065_s19 = smov 64   ;;  %vm441_vm13 = vcmask 58368  }
  0x19   :  { %v121_v3 = vld [vmem:[#allocation2] sm:$0x3]  ;;  %v122_v4 = vld [vmem:[#allocation2 + $0x2] sm:$0x3]  ;;  %v123_v6 = vld [vmem:[#allocation2 + $0x4] sm:$0x3]  ;;  %873 = vset.pattern.permute.xlu1 %v1062_v37  ;;  %874 = vset.pattern.permute.xlu2 %v1062_v37 }
  0x1a   :  { %v124_v7 = vld [vmem:[#allocation2 + $0x6] sm:$0x3]  ;;  %233 = vmatpush.msra.mxu0 %v205_v1  ;;  %v130_v9 = vld [vmem:[#allocation5 + $0x2] sm:$0x3]  ;;  %v131_v10 = vld [vmem:[#allocation5 + $0x4] sm:$0x3]  ;;  %v145_v12 = vadd.f32 %v129_v8, %v121_v3 }
  0x1b   :  { %v132_v11 = vld [vmem:[#allocation5 + $0x6] sm:$0x3]  ;;  %v146_v13 = vadd.f32 %v130_v9, %v122_v4  ;;  %v147_v14 = vadd.f32 %v131_v10, %v123_v6  ;;  %v125_v16 = vld [vmem:[#allocation2 + $0x8] sm:$0x3]  ;;  %v126_v17 = vld [vmem:[#allocation2 + $0xa] sm:$0x3] }
  0x1c   :  { %v148_v15 = vadd.f32 %v132_v11, %v124_v7  ;;  %v127_v18 = vld [vmem:[#allocation2 + $0xc] sm:$0x3]  ;;  %234 = vmatpush.msra.mxu0 %v204_v2  ;;  %161 = vst [vmem:[#allocation1] ss:$4 sm:$0xff] %v145_v12  ;;  %v128_v19 = vld [vmem:[#allocation2 + $0xe] sm:$0x3] }
  0x1d   :  { %v133_v20 = vld [vmem:[#allocation5 + $0x8] sm:$0x3]  ;;  %163 = vst [vmem:[#allocation1 + $0x1] ss:$4 sm:$0xff] %v146_v13  ;;  %v134_v21 = vld [vmem:[#allocation5 + $0xa] sm:$0x3] }
  0x1e   :  { %v135_v22 = vld [vmem:[#allocation5 + $0xc] sm:$0x3]  ;;  %v149_v23 = vadd.f32 %v133_v20, %v125_v16  ;;  %235 = vmatpush.msra.mxu0 %v203_v5  ;;  %165 = vst [vmem:[#allocation1 + $0x2] ss:$4 sm:$0xff] %v147_v14  ;;  %v136_v24 = vld [vmem:[#allocation5 + $0xe] sm:$0x3]  ;;  %v150_v25 = vadd.f32 %v134_v21, %v126_v17 }
  0x1f   :  { %v151_v26 = vadd.f32 %v135_v22, %v127_v18  ;;  %167 = vst [vmem:[#allocation1 + $0x3] ss:$4 sm:$0xff] %v148_v15  ;;  %v152_v27 = vadd.f32 %v136_v24, %v128_v19  ;;  %v1181_v34 = vld [vmem:[%s1407_s4] ss:$0 sm:$0xff]  ;;  %v138_v41 = vld [vmem:[%s1405_s2 + $0x2] sm:$0x3] }
  0x20   :  { %169 = vst [vmem:[#allocation1 + $0x20] ss:$4 sm:$0xff] %v149_v23  ;;  %v386_v44 = vmul.f32 -1e+09, %v138_v41  ;;  %v1193_v47 = vshrl.u32 %v249_v40, 7  ;;  %v1195_v48 = vand.u32 127, %v249_v40 }
  0x21   :  { %171 = vst [vmem:[#allocation1 + $0x21] ss:$4 sm:$0xff] %v150_v25  ;;  %v1063_v2 = vmov 1.0   ;;  %s1064_s4 = smov 96   ;;  %v141_v9 = vld [vmem:[%s1405_s2 + $0x8] sm:$0x3] }
  0x22   :  { %173 = vst [vmem:[#allocation1 + $0x22] ss:$4 sm:$0xff] %v151_v26  ;;  %400 = vperm.xlu2 %874, %v386_v44   ;;  %v253_v56 = vadd.s32 24, %v1193_v47  ;;  %v256_v57 = vmul.u32 4, %v1195_v48  ;;  %v261_v58 = vadd.s32 1, %v1195_v48  ;;  %v252_v59 = vadd.s32 16, %v1193_v47 }
  0x23   :  { %175 = vst [vmem:[#allocation1 + $0x23] ss:$4 sm:$0xff] %v152_v27  ;;  %v251_v62 = vadd.s32 8, %v1193_v47  ;;  %v389_v10 = vmul.f32 -1e+09, %v141_v9  ;;  %s1067_s25 = smov [#allocation11]  }
  0x24   :  { %vm260_vm1 = vcmp.ge.s32.totalorder %v253_v56, %v256_v57  ;;  %v262_v0 = vmul.u32 4, %v261_v58  ;;  %vm259_vm2 = vcmp.ge.s32.totalorder %v252_v59, %v256_v57  ;;  %vm257_vm9 = vcmp.ge.s32.totalorder %v1193_v47, %v256_v57  ;;  %v139_v11 = vld [vmem:[%s1405_s2 + $0x4] sm:$0x3]  ;;  %v143_v12 = vld [vmem:[%s1405_s2 + $0xc] sm:$0x3]  ;;  %s820_s26 = sshll.u32 %s1067_s25, 4  ;;  %s821_s26 = int_to_ptr.vmem [resolvable:$true] %s820_s26 }
  0x25   :  { %vm258_vm5 = vcmp.ge.s32.totalorder %v251_v62, %v256_v57  ;;  %v387_v13 = vmul.f32 -1e+09, %v139_v11  ;;  %v391_v14 = vmul.f32 -1e+09, %v143_v12  ;;  %v142_v15 = vld [vmem:[%s1405_s2 + $0xa] sm:$0x3] }
  0x26   :  { %v176_v28 = vld.sshfl [vmem:[#allocation1] sm:$0xff pattern:$0x73625140]  ;;  %vm266_vm3 = vcmp.lt.s32.totalorder %v253_v56, %v262_v0  ;;  %vm265_vm4 = vcmp.lt.s32.totalorder %v252_v59, %v262_v0  ;;  %vm264_vm6 = vcmp.lt.s32.totalorder %v251_v62, %v262_v0  ;;  %vm263_vm10 = vcmp.lt.s32.totalorder %v1193_v47, %v262_v0 }
  0x27   :  { %838 = vmatmul.msk.f32.vlgmr.msra.gmra.mxu0 %vm211_vm0, %v176_v28  ;;  %186 = vst [vmem:[#allocation1] ss:$4 sm:$0xff] %v121_v3  ;;  %vm270_vm7 = vmand %vm260_vm1, %vm266_vm3 }
  0x28   :  { %188 = vst [vmem:[#allocation1 + $0x1] ss:$4 sm:$0xff] %v122_v4  ;;  %847 = vmatpush.msk.msra.mxu1 %vm270_vm7, %v1063_v2  ;;  %vm269_vm8 = vmand %vm259_vm2, %vm265_vm4  ;;  %v140_v4 = vld [vmem:[%s1405_s2 + $0x6] sm:$0x3]  ;;  %vm530_vm2 = vcmask 64512   ;;  %vm798_vm4 = vcmask 1041409  }
  0x29   :  { %190 = vst [vmem:[#allocation1 + $0x2] ss:$4 sm:$0xff] %v123_v6  ;;  %vm268_vm11 = vmand %vm258_vm5, %vm264_vm6  ;;  %v388_v6 = vmul.f32 -1e+09, %v140_v4  ;;  %vm800_vm5 = vcmask 1042434   ;;  %vm802_vm6 = vcmask 1043459  }
  0x2a   :  { %192 = vst [vmem:[#allocation1 + $0x3] ss:$4 sm:$0xff] %v124_v7  ;;  %v177_v29 = vld.sshfl [vmem:[#allocation1 + $0x20] sm:$0xff pattern:$0x73625140]  ;;  %848 = vmatpush.msk.msra.mxu1 %vm269_vm8, %v1063_v2  ;;  %vm267_vm12 = vmand %vm257_vm9, %vm263_vm10  ;;  %405 = vperm.xlu2 %874, %v387_v13   ;;  %vm804_vm7 = vcmask 1044484  }
  0x2b   :  { %194 = vst [vmem:[#allocation1 + $0x20] ss:$4 sm:$0xff] %v125_v16  ;;  %v137_v7 = vld [vmem:[%s1405_s2] sm:$0x3]  ;;  %v390_v16 = vmul.f32 -1e+09, %v142_v15 }
  0x2c   :  { %196 = vst [vmem:[#allocation1 + $0x21] ss:$4 sm:$0xff] %v126_v17  ;;  %849 = vmatpush.msk.msra.mxu1 %vm268_vm11, %v1063_v2  ;;  %v385_v8 = vmul.f32 -1e+09, %v137_v7  ;;  %v144_v17 = vld [vmem:[%s1405_s2 + $0xe] sm:$0x3] }
  0x2d   :  { %198 = vst [vmem:[#allocation1 + $0x22] ss:$4 sm:$0xff] %v127_v18  ;;  %v392_v18 = vmul.f32 -1e+09, %v144_v17  ;;  %v279_v17 = vmul.u32 4, %v1193_v47  ;;  %vm806_vm8 = vcmask 1045509  }
  0x2e   :  { %200 = vst [vmem:[#allocation1 + $0x23] ss:$4 sm:$0xff] %v128_v19  ;;  %850 = vmatpush.msk.msra.mxu1 %vm267_vm12, %v1063_v2  ;;  %vm808_vm9 = vcmask 1046534   ;;  %vm810_vm10 = vcmask 1047559   ;;  %vm581_vm11 = vcmask 254976   ;;  %vm813_vm12 = vcmask 15360  }
  0x2f   :  { %839 = vmatmul.msk.f32.gmra.mxu0 %vm211_vm0, %v177_v29  ;;  %vm280_vm14 = vcmp.ge.s32.totalorder %v1195_v48, %v279_v17  ;;  %s822_s2 = sshll.u32 %s1416_s13, 4  ;;  %s823_s2 = int_to_ptr.hbm [resolvable:$true] %s822_s2 }
  0x31   :  { %v201_v30 = vld.sshfl [vmem:[#allocation1] sm:$0xff pattern:$0x73625140] }
  0x32   :  { %420 = vperm.xlu2 %874, %v390_v16  }
  0x35   :  { %v202_v31 = vld.sshfl [vmem:[#allocation1 + $0x20] sm:$0xff pattern:$0x73625140] }
  0x37   :  { %840 = vmatmul.msk.f32.gmra.mxu0 %vm211_vm0, %v201_v30 }
  0x3a   :  { %430 = vperm.xlu2 %874, %v392_v18   ;;  %v281_v18 = vadd.s32 1, %v1193_v47 }
  0x3f   :  { %841 = vmatmul.msk.f32.gmra.mxu0 %vm211_vm0, %v202_v31 }
  0x7c   :  { %v401_v21 = vpop.permute.xlu2 %400 }
  0x84   :  { %v406_v24 = vpop.permute.xlu2 %405 }
  0x8c   :  { %v421_v27 = vpop.permute.xlu2 %420 }
  0x94   :  { %v431_v44 = vpop.permute.xlu2 %430 }
  0xa4   :  { %v237_v32 = vpop.f32.mrf.mxu0 }
  0xa5   :  { %v238_v38 = vadd.f32 %v1181_v34, %v237_v32 }
  0xa7   :  { %v289_v42 = vrot.slane %v238_v38, 2  ;;  %v290_v43 = vrot.slane %v238_v38, 4  ;;  %v291_v45 = vrot.slane %v238_v38, 6 }
  0xac   :  { %v240_v33 = vpop.f32.mrf.mxu0 }
  0xad   :  { %v241_v39 = vadd.f32 %v1181_v34, %v240_v33 }
  0xaf   :  { %v292_v52 = vrot.slane %v241_v39, 2  ;;  %v293_v53 = vrot.slane %v241_v39, 4  ;;  %v294_v60 = vrot.slane %v241_v39, 6 }
  0xb4   :  { %v243_v35 = vpop.f32.mrf.mxu0 }
  0xb5   :  { %v1184_v36 = vadd.f32 %v1181_v34, %v243_v35 }
  0xb7   :  { %302 = vrot.lane.b32.xlu0 %v1184_v36, %s1054_s21 }
  0xbc   :  { %v246_v22 = vpop.f32.mrf.mxu0 }
  0xbd   :  { %v247_v23 = vadd.f32 %v1181_v34, %v246_v22 }
 0x129   :  { %v303_v46 = vpop.permute.xlu0 %302 }
 0x12a   :  { %v305_v49 = vmul.f32 %v303_v46, %v238_v38  ;;  %v306_v50 = vmul.f32 %v303_v46, %v289_v42  ;;  %v307_v51 = vmul.f32 %v303_v46, %v290_v43  ;;  %v308_v54 = vmul.f32 %v303_v46, %v291_v45 }
 0x12b   :  { %v309_v55 = vmul.f32 %v303_v46, %v241_v39  ;;  %v310_v61 = vmul.f32 %v303_v46, %v292_v52  ;;  %v311_v63 = vmul.f32 %v303_v46, %v293_v53  ;;  %v312_v1 = vmul.f32 %v303_v46, %v294_v60 }
 0x12c   :  { %321 = vst [vmem:[#allocation1] ss:$4 sm:$0xff] %v305_v49 }
 0x12d   :  { %323 = vst [vmem:[#allocation1 + $0x1] ss:$4 sm:$0xff] %v306_v50 }
 0x12e   :  { %325 = vst [vmem:[#allocation1 + $0x2] ss:$4 sm:$0xff] %v307_v51 }
 0x12f   :  { %327 = vst [vmem:[#allocation1 + $0x3] ss:$4 sm:$0xff] %v308_v54 }
 0x130   :  { %329 = vst [vmem:[#allocation1 + $0x20] ss:$4 sm:$0xff] %v309_v55 }
 0x131   :  { %331 = vst [vmem:[#allocation1 + $0x21] ss:$4 sm:$0xff] %v310_v61 }
 0x132   :  { %333 = vst [vmem:[#allocation1 + $0x22] ss:$4 sm:$0xff] %v311_v63 }
 0x133   :  { %335 = vst [vmem:[#allocation1 + $0x23] ss:$4 sm:$0xff] %v312_v1 }
 0x136   :  { %v336_v3 = vld.sshfl [vmem:[#allocation1] sm:$0xff pattern:$0x73625140] }
 0x137   :  { %338 = vrot.lane.b32.xlu0 %v336_v3, %s1064_s4 }
 0x13a   :  { %v337_v5 = vld.sshfl [vmem:[#allocation1 + $0x20] sm:$0xff pattern:$0x73625140] }
 0x13b   :  { %340 = vrot.lane.b32.xlu1 %v337_v5, %s1064_s4 }
 0x13f   :  { %410 = vperm.xlu0 %875, %v388_v6  }
 0x143   :  { %395 = vperm.xlu1 %873, %v385_v8  }
 0x147   :  { %559 = vrot.lane.b32.xlu0 %v1184_v36, %s1065_s19 }
 0x14b   :  { %415 = vperm.xlu1 %873, %v389_v10  }
 0x153   :  { %425 = vperm.xlu1 %873, %v391_v14  }
 0x15b   :  { %561 = vrot.lane.b32.xlu1 %v247_v23, %s1065_s19 }
 0x1a9   :  { %v339_v19 = vpop.permute.xlu0 %338 }
 0x1aa   :  { %851 = vmatmul.msk.f32.vlgmr.msra.gmra.mxu1 %vm211_vm0, %v339_v19 }
 0x1ad   :  { %v341_v20 = vpop.permute.xlu1 %340 }
 0x1b1   :  { %v411_v35 = vpop.permute.xlu0 %410 }
 0x1b2   :  { %852 = vmatmul.msk.f32.gmra.mxu1 %vm211_vm0, %v341_v20  ;;  %v282_v20 = vmul.u32 4, %v281_v18 }
 0x1b4   :  { %vm283_vm15 = vcmp.lt.s32.totalorder %v1195_v48, %v282_v20 }
 0x1b5   :  { %v396_v25 = vpop.permute.xlu1 %395  ;;  %vm284_vm1 = vmand %vm280_vm14, %vm283_vm15 }
 0x1b6   :  { %853 = vmatpush.msk.msra.mxu2 %vm284_vm1, %v1063_v2 }
 0x1bd   :  { %v416_v28 = vpop.permute.xlu1 %415 }
 0x1c5   :  { %v426_v45 = vpop.permute.xlu1 %425 }
 0x227   :  { %v363_v26 = vpop.f32.mrf.mxu1 }
 0x228   :  { %v369_v29 = vmul.f32 0.5, %v363_v26 }
 0x22a   :  { %v373_v30 = vrot.slane %v369_v29, 2  ;;  %v374_v31 = vrot.slane %v369_v29, 4  ;;  %v375_v32 = vrot.slane %v369_v29, 6  ;;  %v433_v37 = vadd.f32 %v396_v25, %v369_v29 }
 0x22c   :  { %v434_v38 = vadd.f32 %v401_v21, %v373_v30  ;;  %v435_v39 = vadd.f32 %v406_v24, %v374_v31  ;;  %v436_v40 = vadd.f32 %v411_v35, %v375_v32  ;;  %v442_v52 = vsel %vm441_vm13, %v433_v37, -inf }
 0x22e   :  { %v443_v53 = vsel %vm441_vm13, %v434_v38, -inf  ;;  %v444_v54 = vsel %vm441_vm13, %v435_v39, -inf  ;;  %v445_v55 = vsel %vm441_vm13, %v436_v40, -inf }
 0x22f   :  { %v366_v33 = vpop.f32.mrf.mxu1 }
 0x230   :  { %v370_v36 = vmul.f32 0.5, %v366_v33 }
 0x232   :  { %v376_v41 = vrot.slane %v370_v36, 2  ;;  %v377_v34 = vrot.slane %v370_v36, 4  ;;  %v378_v42 = vrot.slane %v370_v36, 6  ;;  %v437_v43 = vadd.f32 %v416_v28, %v370_v36 }
 0x234   :  { %v438_v46 = vadd.f32 %v421_v27, %v376_v41  ;;  %v439_v49 = vadd.f32 %v426_v45, %v377_v34  ;;  %v440_v50 = vadd.f32 %v431_v44, %v378_v42  ;;  %v446_v51 = vsel %vm441_vm13, %v437_v43, -inf }
 0x235   :  { %v447_v59 = vmax.f32 %v442_v52, %v446_v51 }
 0x236   :  { %v448_v56 = vsel %vm441_vm13, %v438_v46, -inf  ;;  %v450_v57 = vsel %vm441_vm13, %v439_v49, -inf  ;;  %v452_v58 = vsel %vm441_vm13, %v440_v50, -inf }
 0x237   :  { %v449_v60 = vmax.f32 %v443_v53, %v448_v56  ;;  %v451_v61 = vmax.f32 %v444_v54, %v450_v57  ;;  %v453_v62 = vmax.f32 %v445_v55, %v452_v58 }
 0x239   :  { %v454_v63 = vmax.f32 %v447_v59, %v449_v60  ;;  %v455_v0 = vmax.f32 %v451_v61, %v453_v62 }
 0x23b   :  { %v456_v1 = vmax.f32 %v454_v63, %v455_v0  ;;  %v1066_v0 = vmov 8.0  }
 0x23d   :  { %v457_v3 = vsub.f32 %v433_v37, %v456_v1  ;;  %v458_v4 = vsub.f32 %v434_v38, %v456_v1  ;;  %v459_v5 = vsub.f32 %v435_v39, %v456_v1  ;;  %v460_v6 = vsub.f32 %v436_v40, %v456_v1 }
 0x23e   :  { %v461_v8 = vsub.f32 %v437_v43, %v456_v1  ;;  %v462_v11 = vsub.f32 %v438_v46, %v456_v1  ;;  %v463_v13 = vsub.f32 %v439_v49, %v456_v1  ;;  %v464_v15 = vsub.f32 %v440_v50, %v456_v1 }
 0x23f   :  { %v465_v7 = vmul.f32 1.442695, %v457_v3  ;;  %v467_v9 = vmul.f32 1.442695, %v458_v4  ;;  %v469_v10 = vmul.f32 1.442695, %v459_v5  ;;  %v560_v5 = vpop.permute.xlu0 %559 }
 0x240   :  { %v471_v12 = vmul.f32 1.442695, %v460_v6  ;;  %v473_v14 = vmul.f32 1.442695, %v461_v8  ;;  %v475_v16 = vmul.f32 1.442695, %v462_v11 }
 0x241   :  { %881 = vpow2.f32 %v465_v7  ;;  %v477_v19 = vmul.f32 1.442695, %v463_v13  ;;  %v479_v23 = vmul.f32 1.442695, %v464_v15  ;;  %v1262_v7 = vpop.permute.xlu1 %561  ;;  %v599_v11 = vld [vmem:[%s1408_s5 + $0x10] sm:$0xff] }
 0x242   :  { %883 = vpow2.f32 %v467_v9 }
 0x243   :  { %885 = vpow2.f32 %v469_v10  ;;  %v600_v10 = vld [vmem:[%s1408_s5 + $0x18] sm:$0xff] }
 0x244   :  { %887 = vpow2.f32 %v471_v12  ;;  %620 = vmatpush.msra.mxu3 %v600_v10  ;;  %v628_v10 = vld [vmem:[#allocation7] sm:$0xff] }
 0x245   :  { %889 = vpow2.f32 %v473_v14  ;;  %v598_v14 = vld [vmem:[%s1408_s5 + $0x8] sm:$0xff] }
 0x246   :  { %891 = vpow2.f32 %v475_v16  ;;  %621 = vmatpush.msra.mxu3 %v599_v11  ;;  %v674_v11 = vld [vmem:[%s1412_s9 + $0x70] sm:$0xff] }
 0x247   :  { %v882_v21 = vpop.eup %881  ;;  %893 = vpow2.f32 %v477_v19  ;;  %v597_v19 = vld [vmem:[%s1408_s5] sm:$0xff] }
 0x248   :  { %v884_v22 = vpop.eup %883  ;;  %v481_v24 = vsel %vm441_vm13, %v882_v21, 0.0  ;;  %895 = vpow2.f32 %v479_v23  ;;  %622 = vmatpush.msra.mxu3 %v598_v14  ;;  %v671_v14 = vld [vmem:[%s1412_s9 + $0x58] sm:$0xff] }
 0x249   :  { %v886_v25 = vpop.eup %885  ;;  %v482_v26 = vsel %vm441_vm13, %v884_v22, 0.0 }
 0x24a   :  { %v888_v27 = vpop.eup %887  ;;  %v483_v47 = vadd.f32 %v482_v26, %v481_v24  ;;  %v484_v28 = vsel %vm441_vm13, %v886_v25, 0.0  ;;  %623 = vmatpush.msra.mxu3 %v597_v19  ;;  %v631_v24 = vld [vmem:[#allocation7 + $0x18] sm:$0xff]  ;;  %v629_v26 = vld [vmem:[#allocation7 + $0x8] sm:$0xff] }
 0x24b   :  { %v890_v29 = vpop.eup %889  ;;  %v486_v31 = vsel %vm441_vm13, %v888_v27, 0.0  ;;  %v666_v19 = vld [vmem:[%s1412_s9 + $0x30] sm:$0xff] }
 0x24c   :  { %v485_v30 = vadd.f32 %v484_v28, %v483_v47  ;;  %v892_v32 = vpop.eup %891  ;;  %v488_v35 = vsel %vm441_vm13, %v890_v29, 0.0  ;;  %651 = vmatpush.msrb.mxu3 %v631_v24 }
 0x24d   :  { %v894_v36 = vpop.eup %893  ;;  %v490_v38 = vsel %vm441_vm13, %v892_v32, 0.0 }
 0x24e   :  { %v487_v33 = vadd.f32 %v486_v31, %v485_v30  ;;  %v896_v39 = vpop.eup %895  ;;  %v492_v41 = vsel %vm441_vm13, %v894_v36, 0.0 }
 0x24f   :  { %v494_v34 = vsel %vm441_vm13, %v896_v39, 0.0 }
 0x250   :  { %v489_v37 = vadd.f32 %v488_v35, %v487_v33 }
 0x252   :  { %v491_v40 = vadd.f32 %v490_v38, %v489_v37 }
 0x254   :  { %v493_v2 = vadd.f32 %v492_v41, %v491_v40 }
 0x256   :  { %v495_v42 = vadd.f32 %v494_v34, %v493_v2 }
 0x258   :  { %897 = vrcp.f32 %v495_v42 }
 0x259   :  { %899 = vrcp.f32 %v1066_v0 }
 0x25e   :  { %v898_v43 = vpop.eup %897 }
 0x25f   :  { %v499_v44 = vmul.f32 %v898_v43, %v886_v25  ;;  %v500_v45 = vmul.f32 %v898_v43, %v888_v27  ;;  %v498_v46 = vmul.f32 %v898_v43, %v884_v22  ;;  %v497_v49 = vmul.f32 %v898_v43, %v882_v21  ;;  %v900_v1 = vpop.eup %899  ;;  %v630_v25 = vld [vmem:[#allocation7 + $0x10] sm:$0xff] }
 0x260   :  { %v503_v53 = vmul.f32 %v898_v43, %v894_v36  ;;  %v502_v54 = vmul.f32 %v898_v43, %v892_v32  ;;  %v501_v55 = vmul.f32 %v898_v43, %v890_v29  ;;  %v504_v56 = vmul.f32 %v898_v43, %v896_v39  ;;  %652 = vmatpush.msrb.mxu3 %v630_v25 }
 0x261   :  { %v749_v50 = vsel %vm441_vm13, %v499_v44, 0.0  ;;  %517 = vst [vmem:[#allocation1 + $0x2] ss:$4 sm:$0xff] %v499_v44  ;;  %v746_v51 = vsel %vm441_vm13, %v498_v46, 0.0  ;;  %v743_v52 = vsel %vm441_vm13, %v497_v49, 0.0  ;;  %v752_v59 = vsel %vm441_vm13, %v500_v45, 0.0 }
 0x262   :  { %750 = vadd.xlane.f32.xlu1 %v749_v50  ;;  %519 = vst [vmem:[#allocation1 + $0x3] ss:$4 sm:$0xff] %v500_v45  ;;  %747 = vadd.xlane.f32.xlu0 %v746_v51  ;;  %v761_v57 = vsel %vm441_vm13, %v503_v53, 0.0  ;;  %v758_v58 = vsel %vm441_vm13, %v502_v54, 0.0  ;;  %v755_v61 = vsel %vm441_vm13, %v501_v55, 0.0  ;;  %v764_v63 = vsel %vm441_vm13, %v504_v56, 0.0 }
 0x263   :  { %515 = vst [vmem:[#allocation1 + $0x1] ss:$4 sm:$0xff] %v498_v46  ;;  %744 = vadd.xlane.f32.xlu2 %v743_v52  ;;  %v768_v3 = vmul.f32 8.0, %v900_v1  ;;  %vm772_vm3 = vweird.f32 %v900_v1  ;;  %653 = vmatpush.msrb.mxu3 %v629_v26  ;;  %v662_v26 = vld [vmem:[%s1412_s9 + $0x10] sm:$0xff] }
 0x264   :  { %513 = vst [vmem:[#allocation1] ss:$4 sm:$0xff] %v497_v49 }
 0x265   :  { %525 = vst [vmem:[#allocation1 + $0x22] ss:$4 sm:$0xff] %v503_v53  ;;  %v769_v4 = vsub.f32 1.0, %v768_v3  ;;  %654 = vmatpush.msrb.mxu3 %v628_v10 }
 0x266   :  { %523 = vst [vmem:[#allocation1 + $0x21] ss:$4 sm:$0xff] %v502_v54 }
 0x267   :  { %521 = vst [vmem:[#allocation1 + $0x20] ss:$4 sm:$0xff] %v501_v55  ;;  %v770_v6 = vmul.f32 %v900_v1, %v769_v4 }
 0x268   :  { %527 = vst [vmem:[#allocation1 + $0x23] ss:$4 sm:$0xff] %v504_v56 }
 0x269   :  { %v771_v9 = vadd.f32 %v900_v1, %v770_v6 }
 0x26a   :  { %762 = vadd.xlane.f32.xlu1 %v761_v57  ;;  %759 = vadd.xlane.f32.xlu0 %v758_v58 }
 0x26b   :  { %v528_v60 = vld.sshfl [vmem:[#allocation1] sm:$0xff pattern:$0x73625140]  ;;  %753 = vadd.xlane.f32.xlu2 %v752_v59  ;;  %v773_v12 = vsel %vm772_vm3, %v900_v1, %v771_v9 }
 0x26c   :  { %854 = vmatmul.msk.f32.vlgmr.msra.gmra.mxu2 %vm530_vm2, %v528_v60 }
 0x26f   :  { %v529_v62 = vld.sshfl [vmem:[#allocation1 + $0x20] sm:$0xff pattern:$0x73625140] }
 0x273   :  { %756 = vadd.xlane.f32.xlu2 %v755_v61 }
 0x274   :  { %855 = vmatmul.msk.f32.gmra.mxu2 %vm530_vm2, %v529_v62 }
 0x27b   :  { %765 = vadd.xlane.f32.xlu2 %v764_v63 }
 0x2d5   :  { %v748_v13 = vpop.xlane.xlu0 %747  ;;  %v751_v16 = vpop.xlane.xlu1 %750 }
 0x2d6   :  { %v745_v8 = vpop.xlane.xlu2 %744  ;;  %v775_v18 = vmul.f32 %v773_v12, %v748_v13  ;;  %v776_v20 = vmul.f32 %v773_v12, %v751_v16  ;;  %v672_v13 = vld [vmem:[%s1412_s9 + $0x60] sm:$0xff]  ;;  %v669_v16 = vld [vmem:[%s1412_s9 + $0x48] sm:$0xff] }
 0x2d7   :  { %v774_v17 = vmul.f32 %v773_v12, %v745_v8 }
 0x2d8   :  { %v791_v22 = vperm.slane %v775_v18, %v1195_v48  ;;  %v792_v27 = vperm.slane %v776_v20, %v1195_v48  ;;  %v667_v18 = vld [vmem:[%s1412_s9 + $0x38] sm:$0xff]  ;;  %v665_v20 = vld [vmem:[%s1412_s9 + $0x28] sm:$0xff] }
 0x2d9   :  { %v790_v21 = vperm.slane %v774_v17, %v1195_v48  ;;  %v668_v17 = vld [vmem:[%s1412_s9 + $0x40] sm:$0xff] }
 0x2db   :  { %v799_v29 = vsel %vm798_vm4, %v791_v22, %v790_v21  ;;  %v664_v21 = vld [vmem:[%s1412_s9 + $0x20] sm:$0xff]  ;;  %v663_v22 = vld [vmem:[%s1412_s9 + $0x18] sm:$0xff] }
 0x2dc   :  { %v801_v36 = vsel %vm800_vm5, %v792_v27, %v799_v29  ;;  %v661_v27 = vld [vmem:[%s1412_s9 + $0x8] sm:$0xff]  ;;  %v715_v29 = vld [vmem:[%s1414_s11 + $0x70] sm:$0xff] }
 0x2dd   :  { %v760_v47 = vpop.xlane.xlu0 %759  ;;  %v763_v32 = vpop.xlane.xlu1 %762 }
 0x2de   :  { %v754_v15 = vpop.xlane.xlu2 %753  ;;  %v779_v33 = vmul.f32 %v773_v12, %v760_v47  ;;  %v780_v38 = vmul.f32 %v773_v12, %v763_v32  ;;  %v660_v47 = vld [vmem:[%s1412_s9] sm:$0xff]  ;;  %v712_v32 = vld [vmem:[%s1414_s11 + $0x58] sm:$0xff] }
 0x2df   :  { %v777_v23 = vmul.f32 %v773_v12, %v754_v15  ;;  %v670_v15 = vld [vmem:[%s1412_s9 + $0x50] sm:$0xff] }
 0x2e0   :  { %v795_v40 = vperm.slane %v779_v33, %v1195_v48  ;;  %v796_v43 = vperm.slane %v780_v38, %v1195_v48  ;;  %v711_v33 = vld [vmem:[%s1414_s11 + $0x50] sm:$0xff] }
 0x2e1   :  { %v793_v30 = vperm.slane %v777_v23, %v1195_v48  ;;  %v877_v23 = vld [vmem:[%s1409_s6] ss:$0 sm:$0xff]  ;;  %v707_v38 = vld [vmem:[%s1414_s11 + $0x30] sm:$0xff] }
 0x2e3   :  { %v803_v37 = vsel %vm802_vm6, %v793_v30, %v801_v36  ;;  %v714_v30 = vld [vmem:[%s1414_s11 + $0x68] sm:$0xff]  ;;  %v709_v36 = vld [vmem:[%s1414_s11 + $0x40] sm:$0xff] }
 0x2e6   :  { %v757_v28 = vpop.xlane.xlu2 %756 }
 0x2e7   :  { %v778_v31 = vmul.f32 %v773_v12, %v757_v28  ;;  %v716_v28 = vld [vmem:[%s1414_s11 + $0x78] sm:$0xff] }
 0x2e8   :  { %721 = vmatpush.msrb.mxu0 %v716_v28 }
 0x2e9   :  { %v794_v35 = vperm.slane %v778_v31, %v1195_v48  ;;  %v713_v31 = vld [vmem:[%s1414_s11 + $0x60] sm:$0xff] }
 0x2ea   :  { %722 = vmatpush.msrb.mxu0 %v715_v29 }
 0x2eb   :  { %v805_v39 = vsel %vm804_vm7, %v794_v35, %v803_v37  ;;  %v710_v35 = vld [vmem:[%s1414_s11 + $0x48] sm:$0xff]  ;;  %v708_v37 = vld [vmem:[%s1414_s11 + $0x38] sm:$0xff] }
 0x2ec   :  { %v807_v2 = vsel %vm806_vm8, %v795_v40, %v805_v39  ;;  %723 = vmatpush.msrb.mxu0 %v714_v30  ;;  %v706_v39 = vld [vmem:[%s1414_s11 + $0x28] sm:$0xff]  ;;  %v705_v40 = vld [vmem:[%s1414_s11 + $0x20] sm:$0xff] }
 0x2ed   :  { %v809_v50 = vsel %vm808_vm9, %v796_v43, %v807_v2  ;;  %v878_v2 = vld [vmem:[#allocation8] ss:$0 sm:$0xff] }
 0x2ee   :  { %v766_v41 = vpop.xlane.xlu2 %765  ;;  %724 = vmatpush.msrb.mxu0 %v713_v31 }
 0x2ef   :  { %v552_v34 = vpop.f32.mrf.mxu2  ;;  %v781_v42 = vmul.f32 %v773_v12, %v766_v41  ;;  %v673_v12 = vld [vmem:[%s1412_s9 + $0x68] sm:$0xff]  ;;  %v704_v41 = vld [vmem:[%s1414_s11 + $0x18] sm:$0xff] }
 0x2f0   :  { %v565_v44 = vmul.f32 %v560_v5, %v552_v34  ;;  %725 = vmatpush.msrb.mxu0 %v712_v32  ;;  %v703_v34 = vld [vmem:[%s1414_s11 + $0x10] sm:$0xff] }
 0x2f1   :  { %v797_v45 = vperm.slane %v781_v42, %v1195_v48 }
 0x2f2   :  { %v569_v46 = vrot.slane %v565_v44, 2  ;;  %v570_v49 = vrot.slane %v565_v44, 4  ;;  %v571_v52 = vrot.slane %v565_v44, 6  ;;  %v582_v53 = vsel %vm581_vm11, %v565_v44, 0.0  ;;  %726 = vmatpush.msrb.mxu0 %v711_v33 }
 0x2f3   :  { %v811_v51 = vsel %vm810_vm10, %v797_v45, %v809_v50  ;;  %v702_v45 = vld [vmem:[%s1414_s11 + $0x8] sm:$0xff] }
 0x2f4   :  { %v583_v54 = vsel %vm581_vm11, %v569_v46, 0.0  ;;  %814 = vst.msk [vmem:[%s1417_s14] sm:$0xff] %vm813_vm12, %v811_v51  ;;  %v585_v56 = vsel %vm581_vm11, %v570_v49, 0.0  ;;  %v587_v48 = vsel %vm581_vm11, %v571_v52, 0.0  ;;  %727 = vmatpush.msrb.mxu0 %v710_v35  ;;  %v701_v46 = vld [vmem:[%s1414_s11] sm:$0xff] }
 0x2f5   :  { %v584_v55 = vadd.f32 %v583_v54, %v582_v53  ;;  %v879_v49 = vld [vmem:[#allocation10] ss:$0 sm:$0xff]  ;;  %v880_v53 = vld [vmem:[%s1415_s12] ss:$0 sm:$0xff] }
 0x2f6   :  { %728 = vmatpush.msrb.mxu0 %v709_v36 }
 0x2f7   :  { %v586_v57 = vadd.f32 %v585_v56, %v584_v55  ;;  %v555_v58 = vpop.f32.mrf.mxu2 }
 0x2f8   :  { %v566_v59 = vmul.f32 %v1262_v7, %v555_v58  ;;  %v675_v7 = vld [vmem:[%s1412_s9 + $0x78] sm:$0xff]  ;;  %729 = vmatpush.msrb.mxu0 %v708_v37 }
 0x2f9   :  { %v588_v60 = vadd.f32 %v587_v48, %v586_v57  ;;  %680 = vmatpush.msrb.mxu2 %v675_v7 }
 0x2fa   :  { %v572_v61 = vrot.slane %v566_v59, 2  ;;  %v573_v62 = vrot.slane %v566_v59, 4  ;;  %v589_v63 = vsel %vm581_vm11, %v566_v59, 0.0  ;;  %v574_v1 = vrot.slane %v566_v59, 6  ;;  %730 = vmatpush.msrb.mxu0 %v707_v38 }
 0x2fb   :  { %v590_v0 = vadd.f32 %v589_v63, %v588_v60  ;;  %681 = vmatpush.msrb.mxu2 %v674_v11 }
 0x2fc   :  { %v591_v3 = vsel %vm581_vm11, %v572_v61, 0.0  ;;  %v593_v5 = vsel %vm581_vm11, %v573_v62, 0.0  ;;  %v595_v8 = vsel %vm581_vm11, %v574_v1, 0.0  ;;  %731 = vmatpush.msrb.mxu0 %v706_v39 }
 0x2fd   :  { %v592_v4 = vadd.f32 %v591_v3, %v590_v0  ;;  %682 = vmatpush.msrb.mxu2 %v673_v12 }
 0x2fe   :  { %732 = vmatpush.msrb.mxu0 %v705_v40 }
 0x2ff   :  { %v594_v6 = vadd.f32 %v593_v5, %v592_v4  ;;  %683 = vmatpush.msrb.mxu2 %v672_v13 }
 0x300   :  { %733 = vmatpush.msrb.mxu0 %v704_v41 }
 0x301   :  { %v596_v9 = vadd.f32 %v595_v8, %v594_v6  ;;  %684 = vmatpush.msrb.mxu2 %v671_v14 }
 0x302   :  { %734 = vmatpush.msrb.mxu0 %v703_v34 }
 0x303   :  { %856 = vmatmul.msk.f32.vlgmr.msra.gmra.mxu3 %vm211_vm0, %v596_v9  ;;  %685 = vmatpush.msrb.mxu2 %v670_v15 }
 0x304   :  { %735 = vmatpush.msrb.mxu0 %v702_v45 }
 0x305   :  { %686 = vmatpush.msrb.mxu2 %v669_v16 }
 0x306   :  { %736 = vmatpush.msrb.mxu0 %v701_v46 }
 0x307   :  { %687 = vmatpush.msrb.mxu2 %v668_v17 }
 0x309   :  { %688 = vmatpush.msrb.mxu2 %v667_v18 }
 0x30b   :  { %689 = vmatpush.msrb.mxu2 %v666_v19 }
 0x30d   :  { %690 = vmatpush.msrb.mxu2 %v665_v20 }
 0x30f   :  { %691 = vmatpush.msrb.mxu2 %v664_v21 }
 0x311   :  { %692 = vmatpush.msrb.mxu2 %v663_v22 }
 0x313   :  { %693 = vmatpush.msrb.mxu2 %v662_v26 }
 0x315   :  { %694 = vmatpush.msrb.mxu2 %v661_v27 }
 0x317   :  { %695 = vmatpush.msrb.mxu2 %v660_v47 }
 0x386   :  { %v625_v24 = vpop.f32.mrf.mxu3 }
 0x387   :  { %v626_v25 = vadd.f32 %v877_v23, %v625_v24 }
 0x389   :  { %857 = vmatmul.msk.f32.vlgmr.msrb.gmra.mxu3 %vm211_vm0, %v626_v25  ;;  %vm741_vm0 = vcmask 287744  }
 0x40c   :  { %v656_v42 = vpop.f32.mrf.mxu3 }
 0x40d   :  { %v657_v43 = vadd.f32 %v878_v2, %v656_v42 }
 0x40f   :  { %v659_v44 = vmax.f32 %v657_v43, 0.0 }
 0x411   :  { %696 = vmatmul.f32.vlgmr.msrb.gmra.mxu2 %v659_v44 }
 0x494   :  { %v697_v50 = vpop.f32.mrf.mxu2 }
 0x495   :  { %v698_v51 = vadd.f32 %v879_v49, %v697_v50 }
 0x497   :  { %v700_v52 = vmax.f32 %v698_v51, 0.0 }
 0x499   :  { %737 = vmatmul.f32.vlgmr.msrb.gmra.mxu0 %v700_v52 }
 0x516   :  { %v738_v54 = vpop.f32.mrf.mxu0 }
 0x517   :  { %v739_v55 = vadd.f32 %v880_v53, %v738_v54 }
 0x519   :  { %742 = vst.msk [vmem:[#allocation11] sm:$0x3] %vm741_vm0, %v739_v55 }
 0x51a   :  { %825 = dma.vmem_to_hbm [thread:$0]  %s821_s26, 32, %s823_s2, [#allocation4]  }
 0x51b   :  { %1051 = dma.done.wait [#allocation4], 32  }
 0x51c   :  { %1052 = vsyncadd [#allocation4], 4294967264 }
 0x51d   :  { %834 = vsyncpa [#allocation3], 1 }
 0x51e   :  { %835 = vsyncpa [#allocation6], 1 }
 0x51f   :  { %836 = vsyncpa [#allocation9], 1 }
 0x520   :  { %837 = vsyncpa [#allocation4], 1 }

</bundles_post_ra>
